<compile_context>
chip_gen: v7x
topology: tpu7x:2x2x1
jax: 0.10.0
libtpu: 0.0.40
codegen_flags: <defaults>
</compile_context>

<pallas_src>
import jax
import jax.numpy as jnp
import numpy as np
from jax.experimental import pallas as pl
from jax.experimental.pallas import tpu as pltpu


def make_embedding_table(T: int, dimension: int) -> jnp.ndarray:
    """Deterministic sinusoidal table, matching the PyTorch __init__ exactly."""
    assert dimension % 2 == 0, "dimension must be even (sin/cos interleave)"
    position = jnp.arange(T, dtype=jnp.float32)[:, None]                      # (T, 1)
    div_term = jnp.exp(
        jnp.arange(0, dimension, 2, dtype=jnp.float32) * (-np.log(10000.0) / dimension)
    )                                                                          # (dim//2,)
    ang = position * div_term                                                  # (T, dim//2)
    emb = jnp.zeros((T, dimension), dtype=jnp.float32)
    emb = emb.at[:, 0::2].set(jnp.sin(ang))
    emb = emb.at[:, 1::2].set(jnp.cos(ang))
    return emb


def _make_gather_kernel(B: int):
    """Kernel: B overlapped HBM->HBM row DMAs sharing one DMA semaphore."""

    def _gather_kernel(ts_ref, emb_hbm, out_hbm, sem):
        # ts_ref:  scalar-prefetch ref in SMEM with the B timestep indices.
        # emb_hbm: full embedding table, left in HBM (memory_space=pl.ANY).
        # out_hbm: (B, D) output, also left in HBM -> no VMEM staging/writeback.
        # sem:     single shared DMA semaphore (all copies are the same size,
        #          so B starts / B waits on one semaphore are exact).
        copies = [
            pltpu.make_async_copy(
                emb_hbm.at[ts_ref[b]],   # dynamic row select in HBM (source)
                out_hbm.at[b],           # row b of the HBM output (destination)
                sem,
            )
            for b in range(B)
        ]
        # Issue every row gather first (overlapped), then wait on all of them.
        for cp in copies:
            cp.start()
        for cp in copies:
            cp.wait()

    return _gather_kernel


def time_positional_embedding(embedding: jnp.ndarray, timestep: jnp.ndarray) -> jnp.ndarray:
    """Pallas equivalent of `self.embedding[timestep]` (scalar or 1-D batch)."""
    T, D = embedding.shape
    scalar_input = timestep.ndim == 0
    ts = jnp.atleast_1d(timestep).astype(jnp.int32)
    (B,) = ts.shape
    # Clamp: a negative / >= T index would be an unchecked OOB DMA on TPU.
    # (PyTorch would raise on out-of-range indices; we clamp instead.)
    ts = jnp.clip(ts, 0, T - 1)

    itemsize = jnp.dtype(embedding.dtype).itemsize

    grid_spec = pltpu.PrefetchScalarGridSpec(
        num_scalar_prefetch=1,
        grid=(1,),  # single step: all B rows gathered with overlapped DMAs
        in_specs=[
            pl.BlockSpec(memory_space=pl.ANY),        # table stays in HBM
        ],
        out_specs=pl.BlockSpec(memory_space=pl.ANY),  # output stays in HBM too
        scratch_shapes=[pltpu.SemaphoreType.DMA(())],  # one shared DMA semaphore
    )

    out = pl.pallas_call(
        _make_gather_kernel(B),
        out_shape=jax.ShapeDtypeStruct((B, D), embedding.dtype),
        grid_spec=grid_spec,
        compiler_params=pltpu.CompilerParams(
            dimension_semantics=("arbitrary",),
        ),
        cost_estimate=pl.CostEstimate(
            flops=0,
            transcendentals=0,
            bytes_accessed=2 * B * D * itemsize,      # read B rows + write B rows
        ),
    )(ts, embedding)

    return out[0] if scalar_input else out


if __name__ == "__main__":
    T = 1000
    dimension = 128          # lane-dense embedding width (multiple of 128)
    B = 8                    # batch of timesteps (multiple of 8)

    embedding = make_embedding_table(T, dimension)

    key = jax.random.PRNGKey(0)
    timesteps = jax.random.randint(key, (B,), 0, T, dtype=jnp.int32)

    out = time_positional_embedding(embedding, timesteps)
    out = jax.block_until_ready(out)

    # Reference check against plain-JAX gather (same semantics as torch indexing).
    ref = embedding[timesteps]
    np.testing.assert_allclose(np.asarray(out), np.asarray(ref), rtol=0, atol=0)

    # Also exercise the scalar-timestep path (PyTorch forward with a 0-D index).
    out_scalar = jax.block_until_ready(
        time_positional_embedding(embedding, jnp.asarray(123, dtype=jnp.int32))
    )
    np.testing.assert_allclose(np.asarray(out_scalar), np.asarray(embedding[123]),
                               rtol=0, atol=0)

    print("KERNEL_OK")
</pallas_src>

<mosaic_0001>
module attributes {stable_mosaic.version = 11 : i64} {
  func.func @_gather_kernel(%arg0: i32, %arg1: memref<8xi32, #tpu.memory_space<smem>>, %arg2: memref<1000x128xf32, #tpu.memory_space<any>>, %arg3: memref<8x128xf32, #tpu.memory_space<any>>, %arg4: memref<!tpu.dma_semaphore, #tpu.memory_space<semaphore_mem>>) attributes {dimension_semantics = [#tpu.dimension_semantics<arbitrary>], iteration_bounds = array<i64: 1>, scalar_prefetch = 1 : i64, scratch_operands = 1 : i64, tpu.core_type = #tpu.core_type<tc>, window_params = [{}, {}]} {
    %c0 = arith.constant 0 : index
    %0 = memref.load %arg1[%c0] : memref<8xi32, #tpu.memory_space<smem>>
    %c1 = arith.constant 1 : index
    %1 = memref.load %arg1[%c1] : memref<8xi32, #tpu.memory_space<smem>>
    %c2 = arith.constant 2 : index
    %2 = memref.load %arg1[%c2] : memref<8xi32, #tpu.memory_space<smem>>
    %c3 = arith.constant 3 : index
    %3 = memref.load %arg1[%c3] : memref<8xi32, #tpu.memory_space<smem>>
    %c4 = arith.constant 4 : index
    %4 = memref.load %arg1[%c4] : memref<8xi32, #tpu.memory_space<smem>>
    %c5 = arith.constant 5 : index
    %5 = memref.load %arg1[%c5] : memref<8xi32, #tpu.memory_space<smem>>
    %c6 = arith.constant 6 : index
    %6 = memref.load %arg1[%c6] : memref<8xi32, #tpu.memory_space<smem>>
    %c7 = arith.constant 7 : index
    %7 = memref.load %arg1[%c7] : memref<8xi32, #tpu.memory_space<smem>>
    %c0_i32 = arith.constant 0 : i32
    %c0_i32_0 = arith.constant 0 : i32
    %8 = tpu.memref_slice %arg2[%0, %c0_i32_0] : memref<1000x128xf32, #tpu.memory_space<any>> -> memref<1x128xf32, #tpu.memory_space<any>>
    %9 = tpu.memref_squeeze %8 : memref<1x128xf32, #tpu.memory_space<any>> -> memref<128xf32, #tpu.memory_space<any>>
    %c0_i32_1 = arith.constant 0 : i32
    %10 = tpu.memref_slice %arg3[%c0_i32, %c0_i32_1] : memref<8x128xf32, #tpu.memory_space<any>> -> memref<1x128xf32, #tpu.memory_space<any>>
    %11 = tpu.memref_squeeze %10 : memref<1x128xf32, #tpu.memory_space<any>> -> memref<128xf32, #tpu.memory_space<any>>
    tpu.enqueue_dma source(%9 : memref<128xf32, #tpu.memory_space<any>>) target(%11 : memref<128xf32, #tpu.memory_space<any>>) target_semaphore(%arg4 : memref<!tpu.dma_semaphore, #tpu.memory_space<semaphore_mem>>)
    %c1_i32 = arith.constant 1 : i32
    %c0_i32_2 = arith.constant 0 : i32
    %12 = tpu.memref_slice %arg2[%1, %c0_i32_2] : memref<1000x128xf32, #tpu.memory_space<any>> -> memref<1x128xf32, #tpu.memory_space<any>>
    %13 = tpu.memref_squeeze %12 : memref<1x128xf32, #tpu.memory_space<any>> -> memref<128xf32, #tpu.memory_space<any>>
    %c0_i32_3 = arith.constant 0 : i32
    %14 = tpu.memref_slice %arg3[%c1_i32, %c0_i32_3] : memref<8x128xf32, #tpu.memory_space<any>> -> memref<1x128xf32, #tpu.memory_space<any>>
    %15 = tpu.memref_squeeze %14 : memref<1x128xf32, #tpu.memory_space<any>> -> memref<128xf32, #tpu.memory_space<any>>
    tpu.enqueue_dma source(%13 : memref<128xf32, #tpu.memory_space<any>>) target(%15 : memref<128xf32, #tpu.memory_space<any>>) target_semaphore(%arg4 : memref<!tpu.dma_semaphore, #tpu.memory_space<semaphore_mem>>)
    %c2_i32 = arith.constant 2 : i32
    %c0_i32_4 = arith.constant 0 : i32
    %16 = tpu.memref_slice %arg2[%2, %c0_i32_4] : memref<1000x128xf32, #tpu.memory_space<any>> -> memref<1x128xf32, #tpu.memory_space<any>>
    %17 = tpu.memref_squeeze %16 : memref<1x128xf32, #tpu.memory_space<any>> -> memref<128xf32, #tpu.memory_space<any>>
    %c0_i32_5 = arith.constant 0 : i32
    %18 = tpu.memref_slice %arg3[%c2_i32, %c0_i32_5] : memref<8x128xf32, #tpu.memory_space<any>> -> memref<1x128xf32, #tpu.memory_space<any>>
    %19 = tpu.memref_squeeze %18 : memref<1x128xf32, #tpu.memory_space<any>> -> memref<128xf32, #tpu.memory_space<any>>
    tpu.enqueue_dma source(%17 : memref<128xf32, #tpu.memory_space<any>>) target(%19 : memref<128xf32, #tpu.memory_space<any>>) target_semaphore(%arg4 : memref<!tpu.dma_semaphore, #tpu.memory_space<semaphore_mem>>)
    %c3_i32 = arith.constant 3 : i32
    %c0_i32_6 = arith.constant 0 : i32
    %20 = tpu.memref_slice %arg2[%3, %c0_i32_6] : memref<1000x128xf32, #tpu.memory_space<any>> -> memref<1x128xf32, #tpu.memory_space<any>>
    %21 = tpu.memref_squeeze %20 : memref<1x128xf32, #tpu.memory_space<any>> -> memref<128xf32, #tpu.memory_space<any>>
    %c0_i32_7 = arith.constant 0 : i32
    %22 = tpu.memref_slice %arg3[%c3_i32, %c0_i32_7] : memref<8x128xf32, #tpu.memory_space<any>> -> memref<1x128xf32, #tpu.memory_space<any>>
    %23 = tpu.memref_squeeze %22 : memref<1x128xf32, #tpu.memory_space<any>> -> memref<128xf32, #tpu.memory_space<any>>
    tpu.enqueue_dma source(%21 : memref<128xf32, #tpu.memory_space<any>>) target(%23 : memref<128xf32, #tpu.memory_space<any>>) target_semaphore(%arg4 : memref<!tpu.dma_semaphore, #tpu.memory_space<semaphore_mem>>)
    %c4_i32 = arith.constant 4 : i32
    %c0_i32_8 = arith.constant 0 : i32
    %24 = tpu.memref_slice %arg2[%4, %c0_i32_8] : memref<1000x128xf32, #tpu.memory_space<any>> -> memref<1x128xf32, #tpu.memory_space<any>>
    %25 = tpu.memref_squeeze %24 : memref<1x128xf32, #tpu.memory_space<any>> -> memref<128xf32, #tpu.memory_space<any>>
    %c0_i32_9 = arith.constant 0 : i32
    %26 = tpu.memref_slice %arg3[%c4_i32, %c0_i32_9] : memref<8x128xf32, #tpu.memory_space<any>> -> memref<1x128xf32, #tpu.memory_space<any>>
    %27 = tpu.memref_squeeze %26 : memref<1x128xf32, #tpu.memory_space<any>> -> memref<128xf32, #tpu.memory_space<any>>
    tpu.enqueue_dma source(%25 : memref<128xf32, #tpu.memory_space<any>>) target(%27 : memref<128xf32, #tpu.memory_space<any>>) target_semaphore(%arg4 : memref<!tpu.dma_semaphore, #tpu.memory_space<semaphore_mem>>)
    %c5_i32 = arith.constant 5 : i32
    %c0_i32_10 = arith.constant 0 : i32
    %28 = tpu.memref_slice %arg2[%5, %c0_i32_10] : memref<1000x128xf32, #tpu.memory_space<any>> -> memref<1x128xf32, #tpu.memory_space<any>>
    %29 = tpu.memref_squeeze %28 : memref<1x128xf32, #tpu.memory_space<any>> -> memref<128xf32, #tpu.memory_space<any>>
    %c0_i32_11 = arith.constant 0 : i32
    %30 = tpu.memref_slice %arg3[%c5_i32, %c0_i32_11] : memref<8x128xf32, #tpu.memory_space<any>> -> memref<1x128xf32, #tpu.memory_space<any>>
    %31 = tpu.memref_squeeze %30 : memref<1x128xf32, #tpu.memory_space<any>> -> memref<128xf32, #tpu.memory_space<any>>
    tpu.enqueue_dma source(%29 : memref<128xf32, #tpu.memory_space<any>>) target(%31 : memref<128xf32, #tpu.memory_space<any>>) target_semaphore(%arg4 : memref<!tpu.dma_semaphore, #tpu.memory_space<semaphore_mem>>)
    %c6_i32 = arith.constant 6 : i32
    %c0_i32_12 = arith.constant 0 : i32
    %32 = tpu.memref_slice %arg2[%6, %c0_i32_12] : memref<1000x128xf32, #tpu.memory_space<any>> -> memref<1x128xf32, #tpu.memory_space<any>>
    %33 = tpu.memref_squeeze %32 : memref<1x128xf32, #tpu.memory_space<any>> -> memref<128xf32, #tpu.memory_space<any>>
    %c0_i32_13 = arith.constant 0 : i32
    %34 = tpu.memref_slice %arg3[%c6_i32, %c0_i32_13] : memref<8x128xf32, #tpu.memory_space<any>> -> memref<1x128xf32, #tpu.memory_space<any>>
    %35 = tpu.memref_squeeze %34 : memref<1x128xf32, #tpu.memory_space<any>> -> memref<128xf32, #tpu.memory_space<any>>
    tpu.enqueue_dma source(%33 : memref<128xf32, #tpu.memory_space<any>>) target(%35 : memref<128xf32, #tpu.memory_space<any>>) target_semaphore(%arg4 : memref<!tpu.dma_semaphore, #tpu.memory_space<semaphore_mem>>)
    %c7_i32 = arith.constant 7 : i32
    %c0_i32_14 = arith.constant 0 : i32
    %36 = tpu.memref_slice %arg2[%7, %c0_i32_14] : memref<1000x128xf32, #tpu.memory_space<any>> -> memref<1x128xf32, #tpu.memory_space<any>>
    %37 = tpu.memref_squeeze %36 : memref<1x128xf32, #tpu.memory_space<any>> -> memref<128xf32, #tpu.memory_space<any>>
    %c0_i32_15 = arith.constant 0 : i32
    %38 = tpu.memref_slice %arg3[%c7_i32, %c0_i32_15] : memref<8x128xf32, #tpu.memory_space<any>> -> memref<1x128xf32, #tpu.memory_space<any>>
    %39 = tpu.memref_squeeze %38 : memref<1x128xf32, #tpu.memory_space<any>> -> memref<128xf32, #tpu.memory_space<any>>
    tpu.enqueue_dma source(%37 : memref<128xf32, #tpu.memory_space<any>>) target(%39 : memref<128xf32, #tpu.memory_space<any>>) target_semaphore(%arg4 : memref<!tpu.dma_semaphore, #tpu.memory_space<semaphore_mem>>)
    %c0_i32_16 = arith.constant 0 : i32
    %c0_i32_17 = arith.constant 0 : i32
    %40 = tpu.memref_slice %arg2[%0, %c0_i32_17] : memref<1000x128xf32, #tpu.memory_space<any>> -> memref<1x128xf32, #tpu.memory_space<any>>
    %41 = tpu.memref_squeeze %40 : memref<1x128xf32, #tpu.memory_space<any>> -> memref<128xf32, #tpu.memory_space<any>>
    %c0_i32_18 = arith.constant 0 : i32
    %42 = tpu.memref_slice %arg3[%c0_i32_16, %c0_i32_18] : memref<8x128xf32, #tpu.memory_space<any>> -> memref<1x128xf32, #tpu.memory_space<any>>
    %43 = tpu.memref_squeeze %42 : memref<1x128xf32, #tpu.memory_space<any>> -> memref<128xf32, #tpu.memory_space<any>>
    tpu.wait_dma2 semaphore(%arg4 : memref<!tpu.dma_semaphore, #tpu.memory_space<semaphore_mem>>) src(%41 : memref<128xf32, #tpu.memory_space<any>>) dst(%43 : memref<128xf32, #tpu.memory_space<any>>)
    %c1_i32_19 = arith.constant 1 : i32
    %c0_i32_20 = arith.constant 0 : i32
    %44 = tpu.memref_slice %arg2[%1, %c0_i32_20] : memref<1000x128xf32, #tpu.memory_space<any>> -> memref<1x128xf32, #tpu.memory_space<any>>
    %45 = tpu.memref_squeeze %44 : memref<1x128xf32, #tpu.memory_space<any>> -> memref<128xf32, #tpu.memory_space<any>>
    %c0_i32_21 = arith.constant 0 : i32
    %46 = tpu.memref_slice %arg3[%c1_i32_19, %c0_i32_21] : memref<8x128xf32, #tpu.memory_space<any>> -> memref<1x128xf32, #tpu.memory_space<any>>
    %47 = tpu.memref_squeeze %46 : memref<1x128xf32, #tpu.memory_space<any>> -> memref<128xf32, #tpu.memory_space<any>>
    tpu.wait_dma2 semaphore(%arg4 : memref<!tpu.dma_semaphore, #tpu.memory_space<semaphore_mem>>) src(%45 : memref<128xf32, #tpu.memory_space<any>>) dst(%47 : memref<128xf32, #tpu.memory_space<any>>)
    %c2_i32_22 = arith.constant 2 : i32
    %c0_i32_23 = arith.constant 0 : i32
    %48 = tpu.memref_slice %arg2[%2, %c0_i32_23] : memref<1000x128xf32, #tpu.memory_space<any>> -> memref<1x128xf32, #tpu.memory_space<any>>
    %49 = tpu.memref_squeeze %48 : memref<1x128xf32, #tpu.memory_space<any>> -> memref<128xf32, #tpu.memory_space<any>>
    %c0_i32_24 = arith.constant 0 : i32
    %50 = tpu.memref_slice %arg3[%c2_i32_22, %c0_i32_24] : memref<8x128xf32, #tpu.memory_space<any>> -> memref<1x128xf32, #tpu.memory_space<any>>
    %51 = tpu.memref_squeeze %50 : memref<1x128xf32, #tpu.memory_space<any>> -> memref<128xf32, #tpu.memory_space<any>>
    tpu.wait_dma2 semaphore(%arg4 : memref<!tpu.dma_semaphore, #tpu.memory_space<semaphore_mem>>) src(%49 : memref<128xf32, #tpu.memory_space<any>>) dst(%51 : memref<128xf32, #tpu.memory_space<any>>)
    %c3_i32_25 = arith.constant 3 : i32
    %c0_i32_26 = arith.constant 0 : i32
    %52 = tpu.memref_slice %arg2[%3, %c0_i32_26] : memref<1000x128xf32, #tpu.memory_space<any>> -> memref<1x128xf32, #tpu.memory_space<any>>
    %53 = tpu.memref_squeeze %52 : memref<1x128xf32, #tpu.memory_space<any>> -> memref<128xf32, #tpu.memory_space<any>>
    %c0_i32_27 = arith.constant 0 : i32
    %54 = tpu.memref_slice %arg3[%c3_i32_25, %c0_i32_27] : memref<8x128xf32, #tpu.memory_space<any>> -> memref<1x128xf32, #tpu.memory_space<any>>
    %55 = tpu.memref_squeeze %54 : memref<1x128xf32, #tpu.memory_space<any>> -> memref<128xf32, #tpu.memory_space<any>>
    tpu.wait_dma2 semaphore(%arg4 : memref<!tpu.dma_semaphore, #tpu.memory_space<semaphore_mem>>) src(%53 : memref<128xf32, #tpu.memory_space<any>>) dst(%55 : memref<128xf32, #tpu.memory_space<any>>)
    %c4_i32_28 = arith.constant 4 : i32
    %c0_i32_29 = arith.constant 0 : i32
    %56 = tpu.memref_slice %arg2[%4, %c0_i32_29] : memref<1000x128xf32, #tpu.memory_space<any>> -> memref<1x128xf32, #tpu.memory_space<any>>
    %57 = tpu.memref_squeeze %56 : memref<1x128xf32, #tpu.memory_space<any>> -> memref<128xf32, #tpu.memory_space<any>>
    %c0_i32_30 = arith.constant 0 : i32
    %58 = tpu.memref_slice %arg3[%c4_i32_28, %c0_i32_30] : memref<8x128xf32, #tpu.memory_space<any>> -> memref<1x128xf32, #tpu.memory_space<any>>
    %59 = tpu.memref_squeeze %58 : memref<1x128xf32, #tpu.memory_space<any>> -> memref<128xf32, #tpu.memory_space<any>>
    tpu.wait_dma2 semaphore(%arg4 : memref<!tpu.dma_semaphore, #tpu.memory_space<semaphore_mem>>) src(%57 : memref<128xf32, #tpu.memory_space<any>>) dst(%59 : memref<128xf32, #tpu.memory_space<any>>)
    %c5_i32_31 = arith.constant 5 : i32
    %c0_i32_32 = arith.constant 0 : i32
    %60 = tpu.memref_slice %arg2[%5, %c0_i32_32] : memref<1000x128xf32, #tpu.memory_space<any>> -> memref<1x128xf32, #tpu.memory_space<any>>
    %61 = tpu.memref_squeeze %60 : memref<1x128xf32, #tpu.memory_space<any>> -> memref<128xf32, #tpu.memory_space<any>>
    %c0_i32_33 = arith.constant 0 : i32
    %62 = tpu.memref_slice %arg3[%c5_i32_31, %c0_i32_33] : memref<8x128xf32, #tpu.memory_space<any>> -> memref<1x128xf32, #tpu.memory_space<any>>
    %63 = tpu.memref_squeeze %62 : memref<1x128xf32, #tpu.memory_space<any>> -> memref<128xf32, #tpu.memory_space<any>>
    tpu.wait_dma2 semaphore(%arg4 : memref<!tpu.dma_semaphore, #tpu.memory_space<semaphore_mem>>) src(%61 : memref<128xf32, #tpu.memory_space<any>>) dst(%63 : memref<128xf32, #tpu.memory_space<any>>)
    %c6_i32_34 = arith.constant 6 : i32
    %c0_i32_35 = arith.constant 0 : i32
    %64 = tpu.memref_slice %arg2[%6, %c0_i32_35] : memref<1000x128xf32, #tpu.memory_space<any>> -> memref<1x128xf32, #tpu.memory_space<any>>
    %65 = tpu.memref_squeeze %64 : memref<1x128xf32, #tpu.memory_space<any>> -> memref<128xf32, #tpu.memory_space<any>>
    %c0_i32_36 = arith.constant 0 : i32
    %66 = tpu.memref_slice %arg3[%c6_i32_34, %c0_i32_36] : memref<8x128xf32, #tpu.memory_space<any>> -> memref<1x128xf32, #tpu.memory_space<any>>
    %67 = tpu.memref_squeeze %66 : memref<1x128xf32, #tpu.memory_space<any>> -> memref<128xf32, #tpu.memory_space<any>>
    tpu.wait_dma2 semaphore(%arg4 : memref<!tpu.dma_semaphore, #tpu.memory_space<semaphore_mem>>) src(%65 : memref<128xf32, #tpu.memory_space<any>>) dst(%67 : memref<128xf32, #tpu.memory_space<any>>)
    %c7_i32_37 = arith.constant 7 : i32
    %c0_i32_38 = arith.constant 0 : i32
    %68 = tpu.memref_slice %arg2[%7, %c0_i32_38] : memref<1000x128xf32, #tpu.memory_space<any>> -> memref<1x128xf32, #tpu.memory_space<any>>
    %69 = tpu.memref_squeeze %68 : memref<1x128xf32, #tpu.memory_space<any>> -> memref<128xf32, #tpu.memory_space<any>>
    %c0_i32_39 = arith.constant 0 : i32
    %70 = tpu.memref_slice %arg3[%c7_i32_37, %c0_i32_39] : memref<8x128xf32, #tpu.memory_space<any>> -> memref<1x128xf32, #tpu.memory_space<any>>
    %71 = tpu.memref_squeeze %70 : memref<1x128xf32, #tpu.memory_space<any>> -> memref<128xf32, #tpu.memory_space<any>>
    tpu.wait_dma2 semaphore(%arg4 : memref<!tpu.dma_semaphore, #tpu.memory_space<semaphore_mem>>) src(%69 : memref<128xf32, #tpu.memory_space<any>>) dst(%71 : memref<128xf32, #tpu.memory_space<any>>)
    return
  }
}

</mosaic_0001>

<bundles_post_ra>
// kernel: tpu_custom_call.1
= control target key start
LH: loop header
LB: loop body
LE: loop exit
PB: predicated region body
PF: predicated region fallthrough
CT: control target
= control target key end

     0   :  { %s339_s0 = inlined_call_operand.hbm [shape: s32[8], index: 0, kind: input, shape index: {}]   ;;  %s340_s1 = inlined_call_operand.hbm [shape: f32[1000,128], index: 1, kind: input, shape index: {}]   ;;  %s341_s2 = inlined_call_operand.hbm [shape: f32[8,128], index: 2, kind: output, shape index: {}]  }
   0x1   :  { %s211_s11 = scalar_lea.hbm %s339_s0, 16 }
   0x2   :  { %p212_p0 = scmp.ne.s32.totalorder %s339_s0, %s211_s11  ;;  %p215_p1 = scmp.lt.u32.totalorder %s211_s11, %s339_s0 }
   0x4   :  { %p217_p2 = pnand %p215_p1, %p212_p0 }
   0x6   :  { %220 = shalt.err (!%p217_p2)  }
   0x7   :  { %s225_s16 = smov [#allocation4]  }
   0x8   :  { %8 = dma.hbm_to_smem %s339_s0, 16, %s225_s16, [#allocation3] }
   0x9   :  { %221 = dma.done.wait [#allocation3], 16 }
   0xa   :  { %222 = vsyncadd [#allocation3], 4294967280 }
   0xb   :  { %10 = sfence }
   0xc   :  { %s11_s19 = sld [smem:[#allocation4]]  ;;  %s184_s20 = sld [smem:[#allocation4 + $0x1]] }
   0xd   :  { %s185_s21 = sld [smem:[#allocation4 + $0x2]]  ;;  %s186_s22 = sld [smem:[#allocation4 + $0x3]] }
   0xe   :  { %s263_s23 = sld [smem:[#allocation4 + $0x4]]  ;;  %s265_s24 = sld [smem:[#allocation4 + $0x5]] }
   0xf   :  { %s267_s25 = sld [smem:[#allocation4 + $0x6]]  ;;  %s269_s26 = sld [smem:[#allocation4 + $0x7]] }
  0x10   :  { %s36_s29 = scalar_lea.hbm %s341_s2, 16  ;;  %s226_s9 = smov [#allocation2]  }
  0x11   :  { %s227_s10 = smov [#allocation5]   ;;  %s228_s11 = smov 0  }
  0x12   :  { %s191_s0 = sshll.u32 %s11_s19, 4  ;;  %s192_s30 = sshll.u32 %s184_s20, 4 }
  0x13   :  { %s20_s5 = scalar_lea.hbm %s340_s1, %s191_s0  ;;  %s35_s8 = scalar_lea.hbm %s340_s1, %s192_s30 }
  0x14   :  { %33 = dma.general %s20_s5, 16, %s341_s2, %s226_s9, %s227_s10, [#allocation6], %s228_s11, 0  }
  0x15   :  { %s193_s14 = sshll.u32 %s185_s21, 4  ;;  %s229_s15 = smov [#allocation7]  }
  0x16   :  { %49 = dma.general %s35_s8, 16, %s36_s29, %s226_s9, %s229_s15, [#allocation8], %s228_s11, 0  }
  0x17   :  { %s51_s18 = scalar_lea.hbm %s340_s1, %s193_s14  ;;  %s52_s27 = scalar_lea.hbm %s341_s2, 32 }
  0x18   :  { %s194_s28 = sshll.u32 %s186_s22, 4  ;;  %s230_s0 = smov [#allocation9]  }
  0x19   :  { %65 = dma.general %s51_s18, 16, %s52_s27, %s226_s9, %s230_s0, [#allocation10], %s228_s11, 0  }
  0x1a   :  { %s67_s3 = scalar_lea.hbm %s340_s1, %s194_s28  ;;  %s68_s5 = scalar_lea.hbm %s341_s2, 48 }
  0x1b   :  { %s195_s6 = sshll.u32 %s263_s23, 4  ;;  %s231_s7 = smov [#allocation11]  }
  0x1c   :  { %81 = dma.general %s67_s3, 16, %s68_s5, %s226_s9, %s231_s7, [#allocation12], %s228_s11, 0  }
  0x1d   :  { %s83_s10 = scalar_lea.hbm %s340_s1, %s195_s6  ;;  %s84_s14 = scalar_lea.hbm %s341_s2, 64 }
  0x1e   :  { %s196_s15 = sshll.u32 %s265_s24, 4  ;;  %s232_s16 = smov [#allocation13]  }
  0x1f   :  { %97 = dma.general %s83_s10, 16, %s84_s14, %s226_s9, %s232_s16, [#allocation14], %s228_s11, 0  }
  0x20   :  { %s99_s23 = scalar_lea.hbm %s340_s1, %s196_s15  ;;  %s100_s27 = scalar_lea.hbm %s341_s2, 80 }
  0x21   :  { %s197_s28 = sshll.u32 %s267_s25, 4  ;;  %s233_s0 = smov [#allocation15]  }
  0x22   :  { %113 = dma.general %s99_s23, 16, %s100_s27, %s226_s9, %s233_s0, [#allocation16], %s228_s11, 0  }
  0x23   :  { %s115_s24 = scalar_lea.hbm %s340_s1, %s197_s28  ;;  %s116_s29 = scalar_lea.hbm %s341_s2, 96 }
  0x24   :  { %s198_s5 = sshll.u32 %s269_s26, 4  ;;  %s234_s6 = smov [#allocation17]  }
  0x25   :  { %129 = dma.general %s115_s24, 16, %s116_s29, %s226_s9, %s234_s6, [#allocation18], %s228_s11, 0  }
  0x26   :  { %s131_s25 = scalar_lea.hbm %s340_s1, %s198_s5  ;;  %s132_s12 = scalar_lea.hbm %s341_s2, 112 }
  0x27   :  { %s235_s13 = smov [#allocation19]  }
  0x28   :  { %145 = dma.general %s131_s25, 16, %s132_s12, %s226_s9, %s235_s13, [#allocation20], %s228_s11, 0  }
  0x29   :  { %223 = dma.done.wait [#allocation2], 128 }
  0x2a   :  { %224 = vsyncadd [#allocation2], 4294967168 }
  0x2b   :  { %162 = vsyncmov [#allocation2] }
  0x2e   :  { %s163_s26 = vpop.sfrf %162 }
  0x2f   :  { %p199_p3 = scmp.ne.s32.totalorder %s163_s26, 0 }
  0x31   :  { %167 = shalt.err (%p199_p3)  }

</bundles_post_ra>
